<compile_context>
chip_gen: v5e
topology: v5e:2x2
jax: 0.10.0
libtpu: 0.0.40
codegen_flags: <defaults>
</compile_context>

<pallas_src>
import functools

import numpy as np
import jax
import jax.numpy as jnp
from jax.experimental import pallas as pl
from jax.experimental.pallas import tpu as pltpu

# ----------------------------------------------------------------------------
# Static configuration (stand-in sizes; CoFormer.__init__ constants kept)
# ----------------------------------------------------------------------------
MAX_NUM_ROLES = 6            # CoFormer.forward max_num_roles
NUM_ROLE_TOKENS = 190        # CoFormer num_role_tokens
NUM_VERB_TOKENS = 504        # CoFormer num_verb_tokens
HIDDEN = 32                  # transformer.d_model (stand-in size)
NUM_NOUN = 16                # num_noun_classes (stand-in size)
NUM_VERB_CLS = 8             # verb logits produced by the transformer stand-in
BACKBONE_CH = 8              # backbone.num_channels (stand-in)
NUM_LAYERS = 2               # decoder-layer axis of the reference stand-in
POOL_HW = 4                  # backbone stand-in output spatial size
HW = POOL_HW * POOL_HW
SELECTED_ROLES = (3, 17, 42, 101)   # stand-in for vidx_ridx[verb] lookup
NSEL = len(SELECTED_ROLES)
LN_EPS = 1e-5

# Batch folding / fused-LHS row layout (rows per grid step)
BATCH_TILE = 2                       # samples folded into sublane rows per step
R_RA = NSEL * BATCH_TILE             # role rows == final-decode rows per tile
R_VERB0 = 2 * R_RA                   # first verb row inside the stage-1 LHS
R_LHS1 = ((2 * R_RA + BATCH_TILE + 7) // 8) * 8   # stage-1 LHS rows (padded)
R_OUT = R_RA + (R_LHS1 - R_VERB0)    # rows of the per-tile output slab
OUT_LANES = 128                      # lane-dense output width
VERB_COL0 = 3 * HIDDEN               # verb logit columns inside the stage-1 slab

assert R_RA % 8 == 0 and R_OUT % 8 == 0
assert VERB_COL0 + NUM_VERB_CLS <= 128
assert 3 * NUM_NOUN + 5 <= OUT_LANES


# ----------------------------------------------------------------------------
# Layout helpers shared by kernel wrapper, prepare_params and the reference
# ----------------------------------------------------------------------------
def _pool_rows(samples):
    """NCHW images -> channels-last pooled token rows [B, HW, C]."""
    b, c, h, w = samples.shape
    pooled = samples.reshape(b, c, POOL_HW, h // POOL_HW,
                             POOL_HW, w // POOL_HW).mean(axis=(3, 5))
    return jnp.transpose(pooled, (0, 2, 3, 1)).reshape(b, HW, c)


def _positional_rows():
    """Deterministic positional encoding rows [HW, HIDDEN] (stand-in)."""
    ch = jnp.arange(HIDDEN, dtype=jnp.float32)
    yy = jnp.arange(POOL_HW, dtype=jnp.float32)
    xx = jnp.arange(POOL_HW, dtype=jnp.float32)
    pos = jnp.sin(ch[None, None, :] * 0.1 + yy[:, None, None] * 0.7
                  + xx[None, :, None] * 1.3)
    return pos.reshape(HW, HIDDEN)


# ----------------------------------------------------------------------------
# The fused kernel (one grid step == one batch tile of BATCH_TILE samples)
# ----------------------------------------------------------------------------
def _coformer_kernel(x_ref, enc_ref, g_ref, base_ref, wx_ref, w1_ref, wh_ref,
                     wbb2_ref, w2_ref, bias_ref, out_ref):
    f32 = jnp.float32
    hid, nn = HIDDEN, NUM_NOUN

    # backbone 1x1 conv -> input_proj -> encoder linear, folded into ONE
    # [BT*HW,3]@[3,hid] matmul (positional term + all biases precomputed rows).
    mem = jnp.maximum(
        jnp.dot(x_ref[0], wx_ref[...], preferred_element_type=f32)
        + enc_ref[...], 0.0)                                   # [BT*HW, hid]

    # per-sample image feature, broadcast onto role / final / verb rows via a
    # single block-structured mean/expand matrix (stays on the MXU).
    lhs1 = base_ref[...] + jnp.dot(g_ref[...], mem,
                                   preferred_element_type=f32)  # [R_LHS1, hid]

    # stage 1: [w_role | w_agg | w_fin | w_verb] in one matmul over all rows
    # (rl token folded into the agg bias, il token into the verb bias).
    s1 = (jnp.dot(lhs1, w1_ref[...], preferred_element_type=f32)
          + bias_ref[0:1, 0:128])                               # [R_LHS1, 128]
    ex = jnp.maximum(s1[0:R_RA, 0:hid], 0.0)                    # role decode
    ag = s1[0:R_RA, hid:2 * hid]                                # aggregation
    fin = jnp.maximum(s1[R_RA:2 * R_RA, 2 * hid:3 * hid], 0.0)  # final decode

    def layernorm(v, g, b):
        mu = jnp.mean(v, axis=-1, keepdims=True)
        var = jnp.mean((v - mu) ** 2, axis=-1, keepdims=True)
        return (v - mu) * jax.lax.rsqrt(var + LN_EPS) * g + b

    ex_ln = layernorm(ex, bias_ref[4:5, 0:hid], bias_ref[5:6, 0:hid])   # ln1
    ag_ln = layernorm(ag, bias_ref[6:7, 0:hid], bias_ref[7:8, 0:hid])   # ln2

    # head hidden stage: [w_n3_1 | w_bc_1 | w_bb_1] in one matmul.
    h = jnp.maximum(
        jnp.dot(fin, wh_ref[...], preferred_element_type=f32)
        + bias_ref[1:2, 0:6 * hid], 0.0)                        # [R_RA, 192]
    hb = jnp.maximum(
        jnp.dot(h[:, 4 * hid:6 * hid], wbb2_ref[...],
                preferred_element_type=f32)
        + bias_ref[2:3, 0:2 * hid], 0.0)                        # bbox layer 2

    # output stage: ONE K=256 matmul over [ex_ln | ag_ln | h3 | hc | hb]
    # against a block-structured weight -> one lane-dense slab.
    lhs2 = jnp.concatenate([ex_ln, ag_ln, h[:, 0:4 * hid], hb], axis=1)
    y2 = (jnp.dot(lhs2, w2_ref[...], preferred_element_type=f32)
          + bias_ref[3:4, 0:OUT_LANES])                         # [R_RA, 128]

    # only the bbox columns get .sigmoid(); exact + overflow-free via tanh(EUP)
    col = jax.lax.broadcasted_iota(jnp.int32, y2.shape, 1)
    is_bbox = (col >= 3 * nn) & (col < 3 * nn + 4)
    y2 = jnp.where(is_bbox, 0.5 * (jnp.tanh(0.5 * y2) + 1.0), y2)

    # single unmasked [R_OUT,128] store: head rows then verb rows.
    out_ref[0] = jnp.concatenate([y2, s1[R_VERB0:R_LHS1, :]], axis=0)


def _shared_spec(shape):
    """Whole-array block, same block every grid step (packed weights)."""
    return pl.BlockSpec(shape, lambda i: (0,) * len(shape))


def _build_call(n_tiles):
    in_specs = [
        pl.BlockSpec((1, BATCH_TILE * HW, 3), lambda i: (i, 0, 0)),  # image rows
        _shared_spec((BATCH_TILE * HW, HIDDEN)),   # pos/bias encoder rows
        _shared_spec((R_LHS1, BATCH_TILE * HW)),   # mean / broadcast matrix
        _shared_spec((R_LHS1, HIDDEN)),            # role / fin base token rows
        _shared_spec((3, HIDDEN)),                 # folded image->hidden weight
        _shared_spec((HIDDEN, 128)),               # stage-1 packed weight
        _shared_spec((HIDDEN, 6 * HIDDEN)),        # head hidden packed weight
        _shared_spec((2 * HIDDEN, 2 * HIDDEN)),    # bbox middle-layer weight
        _shared_spec((8 * HIDDEN, OUT_LANES)),     # head output packed weight
        _shared_spec((8, 256)),                    # packed biases + LN params
    ]
    return pl.pallas_call(
        _coformer_kernel,
        grid=(n_tiles,),
        in_specs=in_specs,
        out_specs=pl.BlockSpec((1, R_OUT, OUT_LANES), lambda i: (i, 0, 0)),
        out_shape=jax.ShapeDtypeStruct((n_tiles, R_OUT, OUT_LANES), jnp.float32),
        compiler_params=pltpu.CompilerParams(dimension_semantics=("parallel",)),
    )


# ----------------------------------------------------------------------------
# One-time weight packing / folding (outside the per-forward jit)
# ----------------------------------------------------------------------------
def prepare_params(params):
    hid, nn, nvc = HIDDEN, NUM_NOUN, NUM_VERB_CLS
    f32 = jnp.float32
    sel = np.asarray(SELECTED_ROLES)

    # backbone conv ∘ input_proj ∘ encoder-linear (all linear -> exact fold)
    w_x2h = params["w_backbone"] @ params["w_proj"] @ params["w_enc"]
    b_x2h = ((params["b_backbone"] @ params["w_proj"] + params["b_proj"])
             @ params["w_enc"] + params["b_enc"])
    enc_rows = jnp.tile(_positional_rows() @ params["w_enc"] + b_x2h,
                        (BATCH_TILE, 1))

    # block mean/broadcast matrix: rows 0:R_RA role-f, R_RA:2R_RA fin-f,
    # 2R_RA:2R_RA+BT per-sample f for the verb head, rest zero.
    g = np.zeros((R_LHS1, BATCH_TILE * HW), np.float32)
    for s in range(BATCH_TILE):
        g[s * NSEL:(s + 1) * NSEL, s * HW:(s + 1) * HW] = 1.0 / HW
        g[R_RA + s * NSEL:R_RA + (s + 1) * NSEL, s * HW:(s + 1) * HW] = 1.0 / HW
        g[R_VERB0 + s, s * HW:(s + 1) * HW] = 1.0 / HW

    role_sel = params["role_token"][sel]                       # [NSEL, hid]
    fin_sel = role_sel + params["verb_token"][0:1]
    base = jnp.zeros((R_LHS1, hid), f32)
    base = base.at[0:R_RA].set(jnp.tile(role_sel, (BATCH_TILE, 1)))
    base = base.at[R_RA:2 * R_RA].set(jnp.tile(fin_sel, (BATCH_TILE, 1)))

    # stage-1 packed weight/bias: [w_role | w_agg | w_fin | w_verb]
    w_st1 = (jnp.zeros((hid, 128), f32)
             .at[:, 0:hid].set(params["w_role"])
             .at[:, hid:2 * hid].set(params["w_agg"])
             .at[:, 2 * hid:3 * hid].set(params["w_fin"])
             .at[:, VERB_COL0:VERB_COL0 + nvc].set(params["w_verb"]))
    b_st1 = (jnp.zeros((128,), f32)
             .at[0:hid].set(params["b_role"])
             .at[hid:2 * hid].set((params["rl_token"] @ params["w_agg"])[0]
                                  + params["b_agg"])
             .at[2 * hid:3 * hid].set(params["b_fin"])
             .at[VERB_COL0:VERB_COL0 + nvc].set(
                 (params["il_token"] @ params["w_verb"])[0] + params["b_verb"]))

    # head hidden: [w_n3_1 | w_bc_1 | w_bb_1]
    w_h = jnp.concatenate([params["w_n3_1"], params["w_bc_1"],
                           params["w_bb_1"]], axis=1)
    b_h = jnp.concatenate([params["b_n3_1"], params["b_bc_1"],
                           params["b_bb_1"]])

    # head output: block-structured [256,128], cols: n1 0:16 | n2 16:32 |
    # n3 32:48 | bbox 48:52 | conf 52.
    w2 = (jnp.zeros((8 * hid, OUT_LANES), f32)
          .at[0:hid, 0:nn].set(params["w_n1"])
          .at[hid:2 * hid, nn:2 * nn].set(params["w_n2"])
          .at[2 * hid:4 * hid, 2 * nn:3 * nn].set(params["w_n3_2"])
          .at[4 * hid:6 * hid, 3 * nn + 4:3 * nn + 5].set(params["w_bc_2"])
          .at[6 * hid:8 * hid, 3 * nn:3 * nn + 4].set(params["w_bb_3"]))
    b2 = (jnp.zeros((OUT_LANES,), f32)
          .at[0:nn].set(params["b_n1"])
          .at[nn:2 * nn].set(params["b_n2"])
          .at[2 * nn:3 * nn].set(params["b_n3_2"])
          .at[3 * nn:3 * nn + 4].set(params["b_bb_3"])
          .at[3 * nn + 4:3 * nn + 5].set(params["b_bc_2"]))

    # single (8,256) slab for every bias / LN vector (one input spec)
    bias = (jnp.zeros((8, 256), f32)
            .at[0, 0:128].set(b_st1)
            .at[1, 0:6 * hid].set(b_h)
            .at[2, 0:2 * hid].set(params["b_bb_2"])
            .at[3, 0:OUT_LANES].set(b2)
            .at[4, 0:hid].set(params["ln1_g"])
            .at[5, 0:hid].set(params["ln1_b"])
            .at[6, 0:hid].set(params["ln2_g"])
            .at[7, 0:hid].set(params["ln2_b"]))

    return dict(w_x2h=w_x2h, enc_rows=enc_rows, g=jnp.asarray(g), base=base,
                w_st1=w_st1, w_h=w_h, w_bb2=params["w_bb_2"], w2=w2, bias=bias)


# ----------------------------------------------------------------------------
# CoFormer forward (mirrors the torch reference; ONE pallas_call total)
# ----------------------------------------------------------------------------
@functools.partial(jax.jit, static_argnames=("inference",))
def coformer_forward(packed, samples, inference=False):
    b = samples.shape[0]
    pad_b = (-b) % BATCH_TILE
    if pad_b:
        samples = jnp.pad(samples, ((0, pad_b), (0, 0), (0, 0), (0, 0)))
    bp = b + pad_b
    n_tiles = bp // BATCH_TILE

    x_rows = _pool_rows(samples).reshape(n_tiles, BATCH_TILE * HW, 3)

    out = _build_call(n_tiles)(
        x_rows, packed["enc_rows"], packed["g"], packed["base"],
        packed["w_x2h"], packed["w_st1"], packed["w_h"], packed["w_bb2"],
        packed["w2"], packed["bias"])

    head = out[:, 0:R_RA, :].reshape(n_tiles, BATCH_TILE, NSEL, OUT_LANES)
    head = head.reshape(bp, NSEL, OUT_LANES)[:b]
    verb = out[:, R_RA:R_RA + BATCH_TILE, VERB_COL0:VERB_COL0 + NUM_VERB_CLS]
    verb = verb.reshape(bp, NUM_VERB_CLS)[:b]

    nn = NUM_NOUN
    pad = MAX_NUM_ROLES - NSEL

    def pad_roles(t):
        return jnp.pad(t, ((0, 0), (0, pad), (0, 0)))

    res = {"pred_verb": verb}
    if not inference:
        # TODO(synk): in inference mode the fused kernel still computes the
        # noun_1 / noun_2 lanes; only the dict keys are dropped (as in the ref).
        res["pred_noun_1"] = pad_roles(head[:, :, 0:nn])
        res["pred_noun_2"] = pad_roles(head[:, :, nn:2 * nn])
    res["pred_noun_3"] = pad_roles(head[:, :, 2 * nn:3 * nn])
    res["pred_bbox"] = pad_roles(head[:, :, 3 * nn:3 * nn + 4])
    res["pred_bbox_conf"] = pad_roles(head[:, :, 3 * nn + 4:3 * nn + 5])
    return res


# ----------------------------------------------------------------------------
# Pure-JAX reference (same stand-in + CoFormer head math) for validation
# ----------------------------------------------------------------------------
def reference_forward(params, samples, inference=False):
    batch = samples.shape[0]
    layers = NUM_LAYERS
    sel = jnp.asarray(SELECTED_ROLES, dtype=jnp.int32)
    x_rows = _pool_rows(samples)
    pos_rows = jnp.broadcast_to(_positional_rows()[None], (batch, HW, HIDDEN))

    src = x_rows @ params["w_backbone"] + params["b_backbone"]
    proj = src @ params["w_proj"] + params["b_proj"]
    mem = jax.nn.relu((proj + pos_rows) @ params["w_enc"] + params["b_enc"])
    f = mem.mean(axis=1, keepdims=True)                                # [B,1,hid]

    verb_pred = (f[:, 0] + params["il_token"]) @ params["w_verb"] + params["b_verb"]
    rolef = params["role_token"][None] + f                             # [B,190,hid]
    role_feat = jax.nn.relu(rolef @ params["w_role"] + params["b_role"])
    agg = (rolef + params["rl_token"][None]) @ params["w_agg"] + params["b_agg"]
    fin_base = params["role_token"][sel] + params["verb_token"][0:1]
    fin = jax.nn.relu((fin_base[None] + f) @ params["w_fin"] + params["b_fin"])

    ls = (jnp.arange(1, layers + 1, dtype=jnp.float32) / layers
          ).reshape(1, layers, 1, 1)
    ex = ls * role_feat[:, sel, :][:, None]
    fr = ls * fin[:, None]
    ag_sel = agg[:, sel, :]

    def ln(x, g, b):
        mu = x.mean(-1, keepdims=True)
        var = ((x - mu) ** 2).mean(-1, keepdims=True)
        return (x - mu) * jax.lax.rsqrt(var + LN_EPS) * g + b

    n1 = ln(ex, params["ln1_g"], params["ln1_b"]) @ params["w_n1"] + params["b_n1"]
    n2 = ln(ag_sel, params["ln2_g"], params["ln2_b"]) @ params["w_n2"] + params["b_n2"]
    h3 = jax.nn.relu(fr @ params["w_n3_1"] + params["b_n3_1"])
    n3 = h3 @ params["w_n3_2"] + params["b_n3_2"]
    hb = jax.nn.relu(fr @ params["w_bb_1"] + params["b_bb_1"])
    hb = jax.nn.relu(hb @ params["w_bb_2"] + params["b_bb_2"])
    bb = jax.nn.sigmoid(hb @ params["w_bb_3"] + params["b_bb_3"])
    hc = jax.nn.relu(fr @ params["w_bc_1"] + params["b_bc_1"])
    bc = hc @ params["w_bc_2"] + params["b_bc_2"]

    pad = MAX_NUM_ROLES - NSEL

    def last_and_pad(t):
        return jnp.pad(t[:, -1], ((0, 0), (0, pad), (0, 0)))

    out = {"pred_verb": verb_pred}
    if not inference:
        out["pred_noun_1"] = last_and_pad(n1)
        out["pred_noun_2"] = jnp.pad(n2, ((0, 0), (0, pad), (0, 0)))
    out["pred_noun_3"] = last_and_pad(n3)
    out["pred_bbox"] = last_and_pad(bb)
    out["pred_bbox_conf"] = last_and_pad(bc)
    return out


# ----------------------------------------------------------------------------
# Deterministic parameter init (shapes follow CoFormer.__init__)
# ----------------------------------------------------------------------------
def init_params(key):
    hid = HIDDEN
    keys = jax.random.split(key, 40)
    kit = iter(keys)

    def w(shape, scale=0.1):
        return jax.random.normal(next(kit), shape, jnp.float32) * scale

    return dict(
        # backbone stand-in (1x1 conv 3 -> backbone_ch after pooling)
        w_backbone=w((3, BACKBONE_CH)), b_backbone=w((BACKBONE_CH,)),
        # --- CoFormer-owned parameters ---
        w_proj=w((BACKBONE_CH, hid)), b_proj=w((hid,)),        # input_proj (1x1 conv)
        il_token=w((1, hid)), rl_token=w((1, hid)),            # il/rl_token_embed
        verb_token=w((NUM_VERB_TOKENS, hid)),                  # verb_token_embed
        role_token=w((NUM_ROLE_TOKENS, hid)),                  # role_token_embed
        w_n1=w((hid, NUM_NOUN)), b_n1=w((NUM_NOUN,)),          # noun_1_classifier
        w_n2=w((hid, NUM_NOUN)), b_n2=w((NUM_NOUN,)),          # noun_2_classifier
        w_n3_1=w((hid, 2 * hid)), b_n3_1=w((2 * hid,)),        # noun_3_classifier
        w_n3_2=w((2 * hid, NUM_NOUN)), b_n3_2=w((NUM_NOUN,)),
        w_bb_1=w((hid, 2 * hid)), b_bb_1=w((2 * hid,)),        # bbox_predictor
        w_bb_2=w((2 * hid, 2 * hid)), b_bb_2=w((2 * hid,)),
        w_bb_3=w((2 * hid, 4)), b_bb_3=w((4,)),
        w_bc_1=w((hid, 2 * hid)), b_bc_1=w((2 * hid,)),        # bbox_conf_predictor
        w_bc_2=w((2 * hid, 1)), b_bc_2=w((1,)),
        ln1_g=jnp.ones((hid,), jnp.float32), ln1_b=w((hid,)),  # ln1
        ln2_g=jnp.ones((hid,), jnp.float32), ln2_b=w((hid,)),  # ln2
        # --- transformer stand-in parameters ---
        w_enc=w((hid, hid)), b_enc=w((hid,)),
        w_verb=w((hid, NUM_VERB_CLS)), b_verb=w((NUM_VERB_CLS,)),
        w_role=w((hid, hid)), b_role=w((hid,)),
        w_agg=w((hid, hid)), b_agg=w((hid,)),
        w_fin=w((hid, hid)), b_fin=w((hid,)),
    )


if __name__ == "__main__":
    key = jax.random.PRNGKey(0)
    pkey, xkey = jax.random.split(key)
    params = init_params(pkey)
    packed = prepare_params(params)       # one-time weight packing, outside jit
    samples = jax.random.normal(xkey, (4, 3, 16, 16), jnp.float32)  # [B,3,H,W]

    out = coformer_forward(packed, samples, inference=False)
    for leaf in jax.tree_util.tree_leaves(out):
        jax.block_until_ready(leaf)

    b = samples.shape[0]
    assert out["pred_verb"].shape == (b, NUM_VERB_CLS)
    assert out["pred_noun_1"].shape == (b, MAX_NUM_ROLES, NUM_NOUN)
    assert out["pred_noun_2"].shape == (b, MAX_NUM_ROLES, NUM_NOUN)
    assert out["pred_noun_3"].shape == (b, MAX_NUM_ROLES, NUM_NOUN)
    assert out["pred_bbox"].shape == (b, MAX_NUM_ROLES, 4)
    assert out["pred_bbox_conf"].shape == (b, MAX_NUM_ROLES, 1)

    ref = reference_forward(params, samples, inference=False)
    for k in out:
        if not bool(jnp.allclose(out[k], ref[k], rtol=3e-2, atol=3e-3)):
            raise AssertionError(f"Pallas output mismatch vs reference for {k}")

    print("KERNEL_OK")
</pallas_src>

<mosaic_0001>
module attributes {stable_mosaic.version = 11 : i64} {
  func.func @_coformer_kernel(%arg0: i32, %arg1: memref<1x32x3xf32, #tpu.memory_space<vmem>>, %arg2: memref<32x32xf32, #tpu.memory_space<vmem>>, %arg3: memref<24x32xf32, #tpu.memory_space<vmem>>, %arg4: memref<24x32xf32, #tpu.memory_space<vmem>>, %arg5: memref<3x32xf32, #tpu.memory_space<vmem>>, %arg6: memref<32x128xf32, #tpu.memory_space<vmem>>, %arg7: memref<32x192xf32, #tpu.memory_space<vmem>>, %arg8: memref<64x64xf32, #tpu.memory_space<vmem>>, %arg9: memref<256x128xf32, #tpu.memory_space<vmem>>, %arg10: memref<8x256xf32, #tpu.memory_space<vmem>>, %arg11: memref<1x16x128xf32, #tpu.memory_space<vmem>>) attributes {dimension_semantics = [#tpu.dimension_semantics<parallel>], iteration_bounds = array<i64: 2>, scalar_prefetch = 0 : i64, scratch_operands = 0 : i64, tpu.core_type = #tpu.core_type<tc>, window_params = [{transform_indices = @transform_0, window_bounds = array<i64: 1, 32, 3>}, {pipeline_mode = #tpu.pipeline_mode<synchronous>, transform_indices = @transform_1, window_bounds = array<i64: 32, 32>}, {pipeline_mode = #tpu.pipeline_mode<synchronous>, transform_indices = @transform_2, window_bounds = array<i64: 24, 32>}, {pipeline_mode = #tpu.pipeline_mode<synchronous>, transform_indices = @transform_3, window_bounds = array<i64: 24, 32>}, {pipeline_mode = #tpu.pipeline_mode<synchronous>, transform_indices = @transform_4, window_bounds = array<i64: 3, 32>}, {pipeline_mode = #tpu.pipeline_mode<synchronous>, transform_indices = @transform_5, window_bounds = array<i64: 32, 128>}, {pipeline_mode = #tpu.pipeline_mode<synchronous>, transform_indices = @transform_6, window_bounds = array<i64: 32, 192>}, {pipeline_mode = #tpu.pipeline_mode<synchronous>, transform_indices = @transform_7, window_bounds = array<i64: 64, 64>}, {pipeline_mode = #tpu.pipeline_mode<synchronous>, transform_indices = @transform_8, window_bounds = array<i64: 256, 128>}, {pipeline_mode = #tpu.pipeline_mode<synchronous>, transform_indices = @transform_9, window_bounds = array<i64: 8, 256>}, {transform_indices = @transform_10, window_bounds = array<i64: 1, 16, 128>}]} {
    %c0 = arith.constant 0 : index
    %c0_0 = arith.constant 0 : index
    %c0_1 = arith.constant 0 : index
    %0 = vector.load %arg1[%c0, %c0_0, %c0_1] : memref<1x32x3xf32, #tpu.memory_space<vmem>>, vector<1x32x3xf32>
    %1 = vector.shape_cast %0 : vector<1x32x3xf32> to vector<32x3xf32>
    %c0_2 = arith.constant 0 : index
    %c0_3 = arith.constant 0 : index
    %2 = vector.load %arg5[%c0_2, %c0_3] : memref<3x32xf32, #tpu.memory_space<vmem>>, vector<3x32xf32>
    %cst = arith.constant dense<0.000000e+00> : vector<32x32xf32>
    %3 = tpu.matmul %1, %2, %cst {dimension_numbers = #tpu.dot_dimension_numbers<[1], [0], [0], [1], [0, 0, 1, 1], [], []>} : vector<32x3xf32>, vector<3x32xf32>, vector<32x32xf32> -> vector<32x32xf32>
    %c0_4 = arith.constant 0 : index
    %c0_5 = arith.constant 0 : index
    %4 = vector.load %arg2[%c0_4, %c0_5] : memref<32x32xf32, #tpu.memory_space<vmem>>, vector<32x32xf32>
    %5 = arith.addf %3, %4 : vector<32x32xf32>
    %cst_6 = arith.constant 0.000000e+00 : f32
    %6 = vector.broadcast %cst_6 : f32 to vector<32x32xf32>
    %7 = arith.maximumf %5, %6 : vector<32x32xf32>
    %c0_7 = arith.constant 0 : index
    %c0_8 = arith.constant 0 : index
    %8 = vector.load %arg4[%c0_7, %c0_8] : memref<24x32xf32, #tpu.memory_space<vmem>>, vector<24x32xf32>
    %c0_9 = arith.constant 0 : index
    %c0_10 = arith.constant 0 : index
    %9 = vector.load %arg3[%c0_9, %c0_10] : memref<24x32xf32, #tpu.memory_space<vmem>>, vector<24x32xf32>
    %cst_11 = arith.constant dense<0.000000e+00> : vector<24x32xf32>
    %10 = tpu.matmul %9, %7, %cst_11 {dimension_numbers = #tpu.dot_dimension_numbers<[1], [0], [0], [1], [0, 0, 1, 1], [], []>} : vector<24x32xf32>, vector<32x32xf32>, vector<24x32xf32> -> vector<24x32xf32>
    %11 = arith.addf %8, %10 : vector<24x32xf32>
    %c0_12 = arith.constant 0 : index
    %c0_13 = arith.constant 0 : index
    %12 = vector.load %arg6[%c0_12, %c0_13] : memref<32x128xf32, #tpu.memory_space<vmem>>, vector<32x128xf32>
    %cst_14 = arith.constant dense<0.000000e+00> : vector<24x128xf32>
    %13 = tpu.matmul %11, %12, %cst_14 {dimension_numbers = #tpu.dot_dimension_numbers<[1], [0], [0], [1], [0, 0, 1, 1], [], []>} : vector<24x32xf32>, vector<32x128xf32>, vector<24x128xf32> -> vector<24x128xf32>
    %c0_15 = arith.constant 0 : index
    %c0_16 = arith.constant 0 : index
    %14 = vector.load %arg10[%c0_15, %c0_16] : memref<8x256xf32, #tpu.memory_space<vmem>>, vector<1x128xf32>
    %15 = vector.broadcast %14 : vector<1x128xf32> to vector<24x128xf32>
    %16 = arith.addf %13, %15 : vector<24x128xf32>
    %17 = vector.extract_strided_slice %16 {offsets = [0, 0], sizes = [8, 32], strides = [1, 1]} : vector<24x128xf32> to vector<8x32xf32>
    %cst_17 = arith.constant 0.000000e+00 : f32
    %18 = vector.broadcast %cst_17 : f32 to vector<8x32xf32>
    %19 = arith.maximumf %17, %18 : vector<8x32xf32>
    %20 = vector.extract_strided_slice %16 {offsets = [0, 32], sizes = [8, 32], strides = [1, 1]} : vector<24x128xf32> to vector<8x32xf32>
    %21 = vector.extract_strided_slice %16 {offsets = [8, 64], sizes = [8, 32], strides = [1, 1]} : vector<24x128xf32> to vector<8x32xf32>
    %cst_18 = arith.constant 0.000000e+00 : f32
    %22 = vector.broadcast %cst_18 : f32 to vector<8x32xf32>
    %23 = arith.maximumf %21, %22 : vector<8x32xf32>
    %c4 = arith.constant 4 : index
    %c0_19 = arith.constant 0 : index
    %24 = vector.load %arg10[%c4, %c0_19] : memref<8x256xf32, #tpu.memory_space<vmem>>, vector<1x32xf32>
    %c5 = arith.constant 5 : index
    %c0_20 = arith.constant 0 : index
    %25 = vector.load %arg10[%c5, %c0_20] : memref<8x256xf32, #tpu.memory_space<vmem>>, vector<1x32xf32>
    %cst_21 = arith.constant dense<0.000000e+00> : vector<8xf32>
    %26 = vector.multi_reduction <add>, %19, %cst_21 [1] : vector<8x32xf32> to vector<8xf32>
    %27 = vector.shape_cast %26 : vector<8xf32> to vector<8x1xf32>
    %cst_22 = arith.constant 3.200000e+01 : f32
    %28 = vector.broadcast %cst_22 : f32 to vector<8x1xf32>
    %29 = arith.divf %27, %28 : vector<8x1xf32>
    %30 = vector.broadcast %29 : vector<8x1xf32> to vector<8x32xf32>
    %31 = arith.subf %19, %30 : vector<8x32xf32>
    %32 = arith.mulf %31, %31 : vector<8x32xf32>
    %cst_23 = arith.constant dense<0.000000e+00> : vector<8xf32>
    %33 = vector.multi_reduction <add>, %32, %cst_23 [1] : vector<8x32xf32> to vector<8xf32>
    %34 = vector.shape_cast %33 : vector<8xf32> to vector<8x1xf32>
    %cst_24 = arith.constant 3.200000e+01 : f32
    %35 = vector.broadcast %cst_24 : f32 to vector<8x1xf32>
    %36 = arith.divf %34, %35 : vector<8x1xf32>
    %37 = vector.broadcast %29 : vector<8x1xf32> to vector<8x32xf32>
    %38 = arith.subf %19, %37 : vector<8x32xf32>
    %cst_25 = arith.constant 9.99999974E-6 : f32
    %39 = vector.broadcast %cst_25 : f32 to vector<8x1xf32>
    %40 = arith.addf %36, %39 : vector<8x1xf32>
    %41 = math.rsqrt %40 : vector<8x1xf32>
    %42 = vector.broadcast %41 : vector<8x1xf32> to vector<8x32xf32>
    %43 = arith.mulf %38, %42 : vector<8x32xf32>
    %44 = vector.broadcast %24 : vector<1x32xf32> to vector<8x32xf32>
    %45 = arith.mulf %43, %44 : vector<8x32xf32>
    %46 = vector.broadcast %25 : vector<1x32xf32> to vector<8x32xf32>
    %47 = arith.addf %45, %46 : vector<8x32xf32>
    %c6 = arith.constant 6 : index
    %c0_26 = arith.constant 0 : index
    %48 = vector.load %arg10[%c6, %c0_26] : memref<8x256xf32, #tpu.memory_space<vmem>>, vector<1x32xf32>
    %c7 = arith.constant 7 : index
    %c0_27 = arith.constant 0 : index
    %49 = vector.load %arg10[%c7, %c0_27] : memref<8x256xf32, #tpu.memory_space<vmem>>, vector<1x32xf32>
    %cst_28 = arith.constant dense<0.000000e+00> : vector<8xf32>
    %50 = vector.multi_reduction <add>, %20, %cst_28 [1] : vector<8x32xf32> to vector<8xf32>
    %51 = vector.shape_cast %50 : vector<8xf32> to vector<8x1xf32>
    %cst_29 = arith.constant 3.200000e+01 : f32
    %52 = vector.broadcast %cst_29 : f32 to vector<8x1xf32>
    %53 = arith.divf %51, %52 : vector<8x1xf32>
    %54 = vector.broadcast %53 : vector<8x1xf32> to vector<8x32xf32>
    %55 = arith.subf %20, %54 : vector<8x32xf32>
    %56 = arith.mulf %55, %55 : vector<8x32xf32>
    %cst_30 = arith.constant dense<0.000000e+00> : vector<8xf32>
    %57 = vector.multi_reduction <add>, %56, %cst_30 [1] : vector<8x32xf32> to vector<8xf32>
    %58 = vector.shape_cast %57 : vector<8xf32> to vector<8x1xf32>
    %cst_31 = arith.constant 3.200000e+01 : f32
    %59 = vector.broadcast %cst_31 : f32 to vector<8x1xf32>
    %60 = arith.divf %58, %59 : vector<8x1xf32>
    %61 = vector.broadcast %53 : vector<8x1xf32> to vector<8x32xf32>
    %62 = arith.subf %20, %61 : vector<8x32xf32>
    %cst_32 = arith.constant 9.99999974E-6 : f32
    %63 = vector.broadcast %cst_32 : f32 to vector<8x1xf32>
    %64 = arith.addf %60, %63 : vector<8x1xf32>
    %65 = math.rsqrt %64 : vector<8x1xf32>
    %66 = vector.broadcast %65 : vector<8x1xf32> to vector<8x32xf32>
    %67 = arith.mulf %62, %66 : vector<8x32xf32>
    %68 = vector.broadcast %48 : vector<1x32xf32> to vector<8x32xf32>
    %69 = arith.mulf %67, %68 : vector<8x32xf32>
    %70 = vector.broadcast %49 : vector<1x32xf32> to vector<8x32xf32>
    %71 = arith.addf %69, %70 : vector<8x32xf32>
    %c0_33 = arith.constant 0 : index
    %c0_34 = arith.constant 0 : index
    %72 = vector.load %arg7[%c0_33, %c0_34] : memref<32x192xf32, #tpu.memory_space<vmem>>, vector<32x192xf32>
    %cst_35 = arith.constant dense<0.000000e+00> : vector<8x192xf32>
    %73 = tpu.matmul %23, %72, %cst_35 {dimension_numbers = #tpu.dot_dimension_numbers<[1], [0], [0], [1], [0, 0, 1, 1], [], []>} : vector<8x32xf32>, vector<32x192xf32>, vector<8x192xf32> -> vector<8x192xf32>
    %c1 = arith.constant 1 : index
    %c0_36 = arith.constant 0 : index
    %74 = vector.load %arg10[%c1, %c0_36] : memref<8x256xf32, #tpu.memory_space<vmem>>, vector<1x192xf32>
    %75 = vector.broadcast %74 : vector<1x192xf32> to vector<8x192xf32>
    %76 = arith.addf %73, %75 : vector<8x192xf32>
    %cst_37 = arith.constant 0.000000e+00 : f32
    %77 = vector.broadcast %cst_37 : f32 to vector<8x192xf32>
    %78 = arith.maximumf %76, %77 : vector<8x192xf32>
    %79 = vector.extract_strided_slice %78 {offsets = [0, 128], sizes = [8, 64], strides = [1, 1]} : vector<8x192xf32> to vector<8x64xf32>
    %c0_38 = arith.constant 0 : index
    %c0_39 = arith.constant 0 : index
    %80 = vector.load %arg8[%c0_38, %c0_39] : memref<64x64xf32, #tpu.memory_space<vmem>>, vector<64x64xf32>
    %cst_40 = arith.constant dense<0.000000e+00> : vector<8x64xf32>
    %81 = tpu.matmul %79, %80, %cst_40 {dimension_numbers = #tpu.dot_dimension_numbers<[1], [0], [0], [1], [0, 0, 1, 1], [], []>} : vector<8x64xf32>, vector<64x64xf32>, vector<8x64xf32> -> vector<8x64xf32>
    %c2 = arith.constant 2 : index
    %c0_41 = arith.constant 0 : index
    %82 = vector.load %arg10[%c2, %c0_41] : memref<8x256xf32, #tpu.memory_space<vmem>>, vector<1x64xf32>
    %83 = vector.broadcast %82 : vector<1x64xf32> to vector<8x64xf32>
    %84 = arith.addf %81, %83 : vector<8x64xf32>
    %cst_42 = arith.constant 0.000000e+00 : f32
    %85 = vector.broadcast %cst_42 : f32 to vector<8x64xf32>
    %86 = arith.maximumf %84, %85 : vector<8x64xf32>
    %87 = vector.extract_strided_slice %78 {offsets = [0, 0], sizes = [8, 128], strides = [1, 1]} : vector<8x192xf32> to vector<8x128xf32>
    %88 = tpu.concatenate %47, %71, %87, %86 in 1 : vector<8x32xf32>, vector<8x32xf32>, vector<8x128xf32>, vector<8x64xf32> -> vector<8x256xf32>
    %c0_43 = arith.constant 0 : index
    %c0_44 = arith.constant 0 : index
    %89 = vector.load %arg9[%c0_43, %c0_44] : memref<256x128xf32, #tpu.memory_space<vmem>>, vector<256x128xf32>
    %cst_45 = arith.constant dense<0.000000e+00> : vector<8x128xf32>
    %90 = tpu.matmul %88, %89, %cst_45 {dimension_numbers = #tpu.dot_dimension_numbers<[1], [0], [0], [1], [0, 0, 1, 1], [], []>} : vector<8x256xf32>, vector<256x128xf32>, vector<8x128xf32> -> vector<8x128xf32>
    %c3 = arith.constant 3 : index
    %c0_46 = arith.constant 0 : index
    %91 = vector.load %arg10[%c3, %c0_46] : memref<8x256xf32, #tpu.memory_space<vmem>>, vector<1x128xf32>
    %92 = vector.broadcast %91 : vector<1x128xf32> to vector<8x128xf32>
    %93 = arith.addf %90, %92 : vector<8x128xf32>
    %94 = tpu.iota {dimensions = array<i32: 1>} : vector<8x128xi32>
    %c48_i32 = arith.constant 48 : i32
    %95 = vector.broadcast %c48_i32 : i32 to vector<8x128xi32>
    %96 = arith.cmpi sge, %94, %95 : vector<8x128xi32>
    %c52_i32 = arith.constant 52 : i32
    %97 = vector.broadcast %c52_i32 : i32 to vector<8x128xi32>
    %98 = arith.cmpi slt, %94, %97 : vector<8x128xi32>
    %99 = arith.andi %96, %98 : vector<8x128xi1>
    %cst_47 = arith.constant 5.000000e-01 : f32
    %100 = vector.broadcast %cst_47 : f32 to vector<8x128xf32>
    %101 = arith.mulf %100, %93 : vector<8x128xf32>
    %102 = math.tanh %101 : vector<8x128xf32>
    %cst_48 = arith.constant 1.000000e+00 : f32
    %103 = vector.broadcast %cst_48 : f32 to vector<8x128xf32>
    %104 = arith.addf %102, %103 : vector<8x128xf32>
    %cst_49 = arith.constant 5.000000e-01 : f32
    %105 = vector.broadcast %cst_49 : f32 to vector<8x128xf32>
    %106 = arith.mulf %105, %104 : vector<8x128xf32>
    %107 = arith.select %99, %106, %93 : vector<8x128xi1>, vector<8x128xf32>
    %108 = vector.extract_strided_slice %16 {offsets = [16, 0], sizes = [8, 128], strides = [1, 1]} : vector<24x128xf32> to vector<8x128xf32>
    %109 = tpu.concatenate %107, %108 in 0 : vector<8x128xf32>, vector<8x128xf32> -> vector<16x128xf32>
    %c0_50 = arith.constant 0 : index
    %c0_51 = arith.constant 0 : index
    %c0_52 = arith.constant 0 : index
    %110 = vector.load %arg11[%c0_50, %c0_51, %c0_52] : memref<1x16x128xf32, #tpu.memory_space<vmem>>, vector<1x16x128xf32>
    %111 = vector.shape_cast %110 : vector<1x16x128xf32> to vector<16x128xf32>
    %112 = vector.shape_cast %109 : vector<16x128xf32> to vector<1x16x128xf32>
    tpu.vector_store %arg11[%c0_50, %c0_51, %c0_52], %112 {strides = array<i32>} : memref<1x16x128xf32, #tpu.memory_space<vmem>>, vector<1x16x128xf32>,
    return
  }
  func.func @transform_0(%arg0: i32) -> (i32, i32, i32) {
    %c0_i32 = arith.constant 0 : i32
    %c0_i32_0 = arith.constant 0 : i32
    %c0_i32_1 = arith.constant 0 : i32
    return %arg0, %c0_i32, %c0_i32_0 : i32, i32, i32
  }
  func.func @transform_1(%arg0: i32) -> (i32, i32) {
    %c0_i32 = arith.constant 0 : i32
    %c0_i32_0 = arith.constant 0 : i32
    %c0_i32_1 = arith.constant 0 : i32
    return %c0_i32, %c0_i32_0 : i32, i32
  }
  func.func @transform_2(%arg0: i32) -> (i32, i32) {
    %c0_i32 = arith.constant 0 : i32
    %c0_i32_0 = arith.constant 0 : i32
    %c0_i32_1 = arith.constant 0 : i32
    return %c0_i32, %c0_i32_0 : i32, i32
  }
  func.func @transform_3(%arg0: i32) -> (i32, i32) {
    %c0_i32 = arith.constant 0 : i32
    %c0_i32_0 = arith.constant 0 : i32
    %c0_i32_1 = arith.constant 0 : i32
    return %c0_i32, %c0_i32_0 : i32, i32
  }
  func.func @transform_4(%arg0: i32) -> (i32, i32) {
    %c0_i32 = arith.constant 0 : i32
    %c0_i32_0 = arith.constant 0 : i32
    %c0_i32_1 = arith.constant 0 : i32
    return %c0_i32, %c0_i32_0 : i32, i32
  }
  func.func @transform_5(%arg0: i32) -> (i32, i32) {
    %c0_i32 = arith.constant 0 : i32
    %c0_i32_0 = arith.constant 0 : i32
    %c0_i32_1 = arith.constant 0 : i32
    return %c0_i32, %c0_i32_0 : i32, i32
  }
  func.func @transform_6(%arg0: i32) -> (i32, i32) {
    %c0_i32 = arith.constant 0 : i32
    %c0_i32_0 = arith.constant 0 : i32
    %c0_i32_1 = arith.constant 0 : i32
    return %c0_i32, %c0_i32_0 : i32, i32
  }
  func.func @transform_7(%arg0: i32) -> (i32, i32) {
    %c0_i32 = arith.constant 0 : i32
    %c0_i32_0 = arith.constant 0 : i32
    %c0_i32_1 = arith.constant 0 : i32
    return %c0_i32, %c0_i32_0 : i32, i32
  }
  func.func @transform_8(%arg0: i32) -> (i32, i32) {
    %c0_i32 = arith.constant 0 : i32
    %c0_i32_0 = arith.constant 0 : i32
    %c0_i32_1 = arith.constant 0 : i32
    return %c0_i32, %c0_i32_0 : i32, i32
  }
  func.func @transform_9(%arg0: i32) -> (i32, i32) {
    %c0_i32 = arith.constant 0 : i32
    %c0_i32_0 = arith.constant 0 : i32
    %c0_i32_1 = arith.constant 0 : i32
    return %c0_i32, %c0_i32_0 : i32, i32
  }
  func.func @transform_10(%arg0: i32) -> (i32, i32, i32) {
    %c0_i32 = arith.constant 0 : i32
    %c0_i32_0 = arith.constant 0 : i32
    %c0_i32_1 = arith.constant 0 : i32
    return %arg0, %c0_i32, %c0_i32_0 : i32, i32, i32
  }
}

</mosaic_0001>

<bundles_post_ra>
// kernel: coformer_forward.1
= control target key start
LH: loop header
LB: loop body
LE: loop exit
PB: predicated region body
PF: predicated region fallthrough
CT: control target
= control target key end

     0   :  { %s948_s13 = smov 0   ;;  %s1232_s0 = inlined_call_operand.vmem [shape: f32[2,32,3], index: 0, kind: input, shape index: {}]   ;;  %s1233_s1 = inlined_call_operand.vmem [shape: f32[32,32], index: 1, kind: input, shape index: {}]   ;;  %s1234_s2 = inlined_call_operand.vmem [shape: f32[24,32], index: 2, kind: input, shape index: {}]   ;;  %s1235_s3 = inlined_call_operand.vmem [shape: f32[24,32], index: 3, kind: input, shape index: {}]   ;;  %s1236_s4 = inlined_call_operand.vmem [shape: f32[3,32], index: 4, kind: input, shape index: {}]   ;;  %s1237_s5 = inlined_call_operand.vmem [shape: f32[32,128], index: 5, kind: input, shape index: {}]   ;;  %s1238_s6 = inlined_call_operand.vmem [shape: f32[32,192], index: 6, kind: input, shape index: {}]   ;;  %s1239_s7 = inlined_call_operand.vmem [shape: f32[64,64], index: 7, kind: input, shape index: {}]   ;;  %s1240_s8 = inlined_call_operand.vmem [shape: f32[256,128], index: 8, kind: input, shape index: {}]   ;;  %s1241_s9 = inlined_call_operand.vmem [shape: f32[8,256], index: 9, kind: input, shape index: {}]   ;;  %s1242_s10 = inlined_call_operand.vmem [shape: f32[2,16,128], index: 10, kind: output, shape index: {}]  }
   0x1 LB: > { %s828_s14 = sadd.s32 4294967295, %s887_s13   ;;  %p832_p0 = scmp.ge.s32.totalorder %s887_s13, 1  ;;  %s887_s13 = sphi %s948_s13, %s20_s13  }
   0x2   : > { %p312_p1 = scmp.lt.s32.totalorder %s887_s13, 3 }
   0x4   : > { %p313_p2 = pnand %p832_p0, %p312_p1 }
   0x5   : > { %p350_p3 = scmp.lt.s32.totalorder (!%p313_p2), %s828_s14, 1  ;;  %s889_s19 = smov (!%p313_p2), 64  }
   0x6   : > { %316 = sbr.rel (%p313_p2) target bundleno = 1111 (0x457), region = 60  ;;  %s892_s16 = smov (!%p313_p2), 32  }
   0xb   : > { %v364_v0 = vld [vmem:[%s1236_s4] sm:$0x7]  ;;  %vm382_vm0 = vcmask 1042432   ;;  %s1244_s14 = smov (!%p350_p3, %s828_s14), 1  ;;  %vm369_vm1 = vcmask 23552   ;;  %v467_v7 = vld [vmem:[%s1237_s5 + $0x18] sm:$0xff] }
   0xc   : > { %837 = vmatpush.msk.msra.mxu0 %vm382_vm0, %v364_v0  ;;  %s854_s17 = sshll.u32 %s1244_s14, 5  ;;  %v466_v8 = vld [vmem:[%s1237_s5 + $0x10] sm:$0xff]  ;;  %490 = vmatpush.msra.mxu2 %v467_v7  ;;  %v368_v11 = vld [vmem:[%s1233_s1 + $0x18] sm:$0xff]  ;;  %v366_v12 = vld [vmem:[%s1233_s1 + $0x8] sm:$0xff]  ;;  %vm425_vm2 = vcmask 261120   ;;  %v891_v56 = vmov 32.0  }
   0xd   : > { %s354_s20 = scalar_lea.vmem %s1232_s0, %s854_s17  ;;  %v367_v10 = vld [vmem:[%s1233_s1 + $0x10] sm:$0xff]  ;;  %v365_v16 = vld [vmem:[%s1233_s1] sm:$0xff]  ;;  %v423_v24 = vld [vmem:[%s1234_s2 + $0x8] sm:$0xff]  ;;  %873 = vrcp.f32 %v891_v56  ;;  %vm652_vm4 = vcmask 523264   ;;  %s855_s27 = sshll.u32 %s1244_s14, 4 }
   0xe   : > { %v360_v1 = vld [vmem:[%s354_s20] sm:$0xff]  ;;  %v361_v2 = vld [vmem:[%s354_s20 + $0x8] sm:$0xff]  ;;  %v362_v3 = vld [vmem:[%s354_s20 + $0x10] sm:$0xff]  ;;  %491 = vmatpush.msra.mxu2 %v466_v8 }
   0xf   : > { %838 = vmatmul.msk.f32.vlgmr.msra.gmra.mxu0 %vm369_vm1, %v360_v1  ;;  %v363_v4 = vld [vmem:[%s354_s20 + $0x18] sm:$0xff]  ;;  %v422_v23 = vld [vmem:[%s1234_s2] sm:$0xff]  ;;  %v465_v25 = vld [vmem:[%s1237_s5 + $0x8] sm:$0xff]  ;;  %s890_s20 = smov 96  }
  0x10   : > { %492 = vmatpush.msra.mxu2 %v465_v25  ;;  %v464_v26 = vld [vmem:[%s1237_s5] sm:$0xff]  ;;  %v420_v30 = vld [vmem:[%s1235_s3 + $0x8] sm:$0xff]  ;;  %v587_v33 = vld [vmem:[%s1238_s6 + $0x30] sm:$0xff] }
  0x11   : > { %v419_v27 = vld [vmem:[%s1235_s3] sm:$0xff]  ;;  %613 = vmatpush.msra.mxu3 %v587_v33  ;;  %v583_v35 = vld [vmem:[%s1238_s6 + $0x10] sm:$0xff]  ;;  %v588_v43 = vld [vmem:[%s1238_s6 + $0x38] sm:$0xff] }
  0x12   : > { %493 = vmatpush.msra.mxu2 %v464_v26  ;;  %v585_v34 = vld [vmem:[%s1238_s6 + $0x20] sm:$0xff]  ;;  %v586_v44 = vld [vmem:[%s1238_s6 + $0x28] sm:$0xff]  ;;  %v584_v45 = vld [vmem:[%s1238_s6 + $0x18] sm:$0xff] }
  0x13   : > { %614 = vmatpush.msra.mxu3 %v585_v34  ;;  %v581_v36 = vld [vmem:[%s1238_s6] sm:$0xff]  ;;  %v582_v46 = vld [vmem:[%s1238_s6 + $0x8] sm:$0xff]  ;;  %v650_v47 = vld [vmem:[%s1239_s7 + $0x38] sm:$0xff]  ;;  %v874_v58 = vpop.eup %873 }
  0x14   : > { %v1020_v38 = vld [vmem:[%s1241_s9] ss:$0 sm:$0xff]  ;;  %v649_v48 = vld [vmem:[%s1239_s7 + $0x30] sm:$0xff]  ;;  %v648_v54 = vld [vmem:[%s1239_s7 + $0x28] sm:$0xff]  ;;  %v512_v62 = vmul.f32 32.0, %v874_v58  ;;  %vm516_vm3 = vweird.f32 %v874_v58 }
  0x15   : > { %615 = vmatpush.msra.mxu3 %v583_v35  ;;  %v647_v55 = vld [vmem:[%s1239_s7 + $0x20] sm:$0xff]  ;;  %v646_v57 = vld [vmem:[%s1239_s7 + $0x18] sm:$0xff]  ;;  %v645_v59 = vld [vmem:[%s1239_s7 + $0x10] sm:$0xff] }
  0x16   : > { %v424_v60 = vld [vmem:[%s1234_s2 + $0x10] sm:$0xff]  ;;  %v644_v61 = vld [vmem:[%s1239_s7 + $0x8] sm:$0xff]  ;;  %v513_v63 = vsub.f32 1.0, %v512_v62  ;;  %v643_v0 = vld [vmem:[%s1239_s7] sm:$0xff] }
  0x17   : > { %839 = vmatmul.msk.f32.gmra.mxu0 %vm369_vm1, %v361_v2  ;;  %616 = vmatpush.msra.mxu3 %v581_v36  ;;  %v540_v33 = vld [vmem:[%s1241_s9 + $0x7] ss:$0 sm:$0xff]  ;;  %v719_v34 = vld [vmem:[%s1240_s8 + $0xf8] sm:$0xff]  ;;  %v718_v35 = vld [vmem:[%s1240_s8 + $0xf0] sm:$0xff] }
  0x18   : > { %v514_v1 = vmul.f32 %v874_v58, %v513_v63  ;;  %741 = vmatpush.msrb.mxu2 %v719_v34  ;;  %v717_v36 = vld [vmem:[%s1240_s8 + $0xe8] sm:$0xff]  ;;  %v694_v56 = vld [vmem:[%s1240_s8 + $0x30] sm:$0xff] }
  0x19   : > { %633 = vmatpush.msrb.mxu3 %v588_v43  ;;  %v700_v43 = vld [vmem:[%s1240_s8 + $0x60] sm:$0xff]  ;;  %v706_v62 = vld [vmem:[%s1240_s8 + $0x90] sm:$0xff] }
  0x1a   : > { %v515_v2 = vadd.f32 %v874_v58, %v514_v1  ;;  %742 = vmatpush.msrb.mxu2 %v718_v35  ;;  %v705_v1 = vld [vmem:[%s1240_s8 + $0x88] sm:$0xff]  ;;  %v507_v35 = vld [vmem:[%s1241_s9 + $0x5] ss:$0 sm:$0xff] }
  0x1b   : > { %634 = vmatpush.msrb.mxu3 %v586_v44  ;;  %v714_v44 = vld [vmem:[%s1240_s8 + $0xd0] sm:$0xff] }
  0x1c   : > { %743 = vmatpush.msrb.mxu2 %v717_v36 }
  0x1d   : > { %635 = vmatpush.msrb.mxu3 %v584_v45  ;;  %v699_v45 = vld [vmem:[%s1240_s8 + $0x58] sm:$0xff] }
  0x1f   : > { %840 = vmatmul.msk.f32.gmra.mxu0 %vm369_vm1, %v362_v3  ;;  %636 = vmatpush.msrb.mxu3 %v582_v46  ;;  %v1074_v3 = vsel %vm516_vm3, %v874_v58, %v515_v2  ;;  %v713_v46 = vld [vmem:[%s1240_s8 + $0xc8] sm:$0xff]  ;;  %v708_v58 = vld [vmem:[%s1240_s8 + $0xa0] sm:$0xff] }
  0x20   : > { %v693_v2 = vld [vmem:[%s1240_s8 + $0x28] sm:$0xff] }
  0x27   : > { %841 = vmatmul.msk.f32.gmra.mxu0 %vm369_vm1, %v363_v4 }
  0x8c   : > { %v403_v5 = vpop.f32.mrf.mxu0 }
  0x8d   : > { %v404_v19 = vadd.f32 %v403_v5, %v365_v16 }
  0x8f   : > { %v415_v22 = vmax.f32 %v404_v19, 0.0 }
  0x94   : > { %v406_v6 = vpop.f32.mrf.mxu0 }
  0x95   : > { %v407_v17 = vadd.f32 %v406_v6, %v366_v12  ;;  %v848_v6 = vld [vmem:[%s1241_s9 + $0x1] ss:$8 sm:$0x3] }
  0x96   : > { %v592_v8 = vperm.slane %v848_v6, 0  ;;  %v593_v12 = vperm.slane %v848_v6, 1 }
  0x97   : > { %v416_v21 = vmax.f32 %v407_v17, 0.0 }
  0x9c   : > { %v409_v9 = vpop.f32.mrf.mxu0 }
  0x9d   : > { %v410_v14 = vadd.f32 %v409_v9, %v367_v10 }
  0x9f   : > { %v417_v20 = vmax.f32 %v410_v14, 0.0 }
  0xa4   : > { %v412_v13 = vpop.f32.mrf.mxu0 }
  0xa5   : > { %v413_v15 = vadd.f32 %v412_v13, %v368_v11 }
  0xa7   : > { %v418_v18 = vmax.f32 %v413_v15, 0.0 }
  0xa9   : > { %447 = vmatpush.msra.mxu1 %v418_v18 }
  0xab   : > { %448 = vmatpush.msra.mxu1 %v417_v20 }
  0xad   : > { %449 = vmatpush.msra.mxu1 %v416_v21  ;;  %v539_v21 = vld [vmem:[%s1241_s9 + $0x6] ss:$0 sm:$0xff] }
  0xaf   : > { %450 = vmatpush.msra.mxu1 %v415_v22 }
  0xb0   : > { %842 = vmatmul.msk.f32.vlgmr.msra.gmra.mxu1 %vm425_vm2, %v422_v23 }
  0xb1   : > { %664 = vmatpush.msrb.mxu1 %v650_v47  ;;  %v698_v47 = vld [vmem:[%s1240_s8 + $0x50] sm:$0xff] }
  0xb3   : > { %665 = vmatpush.msrb.mxu1 %v649_v48  ;;  %v712_v48 = vld [vmem:[%s1240_s8 + $0xc0] sm:$0xff] }
  0xb5   : > { %666 = vmatpush.msrb.mxu1 %v648_v54 }
  0xb7   : > { %667 = vmatpush.msrb.mxu1 %v647_v55  ;;  %v709_v55 = vld [vmem:[%s1240_s8 + $0xa8] sm:$0xff] }
  0xb8   : > { %843 = vmatmul.msk.f32.gmra.mxu1 %vm425_vm2, %v423_v24  ;;  %v421_v24 = vld [vmem:[%s1235_s3 + $0x10] sm:$0xff] }
  0xb9   : > { %668 = vmatpush.msrb.mxu1 %v646_v57 }
  0xbb   : > { %669 = vmatpush.msrb.mxu1 %v645_v59 }
  0xbd   : > { %670 = vmatpush.msrb.mxu1 %v644_v61 }
  0xbf   : > { %671 = vmatpush.msrb.mxu1 %v643_v0 }
  0xc0   : > { %844 = vmatmul.msk.f32.gmra.mxu1 %vm425_vm2, %v424_v60  ;;  %v707_v60 = vld [vmem:[%s1240_s8 + $0x98] sm:$0xff] }
 0x12d   : > { %v452_v28 = vpop.f32.mrf.mxu1 }
 0x12e   : > { %v461_v29 = vadd.f32 %v452_v28, %v419_v27  ;;  %v651_v27 = vld [vmem:[%s1241_s9 + $0x2] ss:$0 sm:$0xff] }
 0x130   : > { %845 = vmatmul.msk.f32.vlgmr.msra.gmra.mxu2 %vm425_vm2, %v461_v29 }
 0x135   : > { %v455_v31 = vpop.f32.mrf.mxu1 }
 0x136   : > { %v462_v32 = vadd.f32 %v455_v31, %v420_v30 }
 0x138   : > { %846 = vmatmul.msk.f32.gmra.mxu2 %vm425_vm2, %v462_v32 }
 0x13d   : > { %v458_v25 = vpop.f32.mrf.mxu1 }
 0x13e   : > { %v463_v26 = vadd.f32 %v458_v25, %v421_v24 }
 0x140   : > { %847 = vmatmul.msk.f32.gmra.mxu2 %vm425_vm2, %v463_v26 }
 0x1b3   : > { %v495_v37 = vpop.f32.mrf.mxu2 }
 0x1b4   : > { %v1025_v42 = vadd.f32 %v495_v37, %v1020_v38  ;;  %v703_v37 = vld [vmem:[%s1240_s8 + $0x78] sm:$0xff] }
 0x1b5   : > { %721 = vmatpush.msrb.mxu0 %v703_v37 }
 0x1b6   : > { %v504_v52 = vmax.f32 %v1025_v42, 0.0 }
 0x1b8   : > { %v508_v53 = vsel %vm425_vm2, %v504_v52, 0.0 }
 0x1bb   : > { %v498_v39 = vpop.f32.mrf.mxu2 }
 0x1bc   : > { %v499_v40 = vadd.f32 %v498_v39, %v1020_v38  ;;  %v702_v39 = vld [vmem:[%s1240_s8 + $0x70] sm:$0xff] }
 0x1bd   : > { %722 = vmatpush.msrb.mxu0 %v702_v39 }
 0x1be   : > { %v505_v41 = vmax.f32 %v499_v40, 0.0  ;;  %v716_v40 = vld [vmem:[%s1240_s8 + $0xe0] sm:$0xff] }
 0x1bf   : > { %744 = vmatpush.msrb.mxu2 %v716_v40 }
 0x1c0   : > { %597 = vrot.lane.b32.xlu0 %v505_v41, %s889_s19  ;;  %v701_v41 = vld [vmem:[%s1240_s8 + $0x68] sm:$0xff] }
 0x1c1   : > { %723 = vmatpush.msrb.mxu0 %v701_v41 }
 0x1c3   : > { %724 = vmatpush.msrb.mxu0 %v700_v43  ;;  %v501_v6 = vpop.f32.mrf.mxu2 }
 0x1c5   : > { %725 = vmatpush.msrb.mxu0 %v699_v45 }
 0x1c7   : > { %726 = vmatpush.msrb.mxu0 %v698_v47 }
 0x1c8   : > { %542 = vrot.lane.b32.xlu0 %v1025_v42, %s890_s20 }
 0x232   : > { %v598_v49 = vpop.permute.xlu0 %597 }
 0x233   : > { %849 = vmatmul.msk.f32.vlgmr.msra.gmra.mxu3 %vm425_vm2, %v598_v49 }
 0x23a   : > { %v543_v50 = vpop.permute.xlu0 %542 }
 0x23b   : > { %850 = vmatmul.msk.f32.vlgmr.msrb.gmra.mxu3 %vm425_vm2, %v598_v49  ;;  %v545_v51 = vsel %vm425_vm2, %v543_v50, 0.0  ;;  %v697_v49 = vld [vmem:[%s1240_s8 + $0x48] sm:$0xff]  ;;  %v711_v50 = vld [vmem:[%s1240_s8 + $0xb8] sm:$0xff] }
 0x23c   : > { %546 = vadd.xlane.f32.xlu1 %v545_v51  ;;  %v696_v51 = vld [vmem:[%s1240_s8 + $0x40] sm:$0xff]  ;;  %727 = vmatpush.msrb.mxu0 %v697_v49 }
 0x23e   : > { %728 = vmatpush.msrb.mxu0 %v696_v51 }
 0x244   : > { %509 = vadd.xlane.f32.xlu1 %v508_v53  ;;  %v695_v53 = vld [vmem:[%s1240_s8 + $0x38] sm:$0xff] }
 0x245   : > { %729 = vmatpush.msrb.mxu0 %v695_v53 }
 0x247   : > { %730 = vmatpush.msrb.mxu0 %v694_v56 }
 0x249   : > { %731 = vmatpush.msrb.mxu0 %v693_v2 }
 0x25d   : > { %572 = vrot.lane.b32.xlu1 %v539_v21, %s892_s16 }
 0x2af   : > { %v547_v4 = vpop.xlane.xlu1 %546 }
 0x2b0   : > { %v548_v5 = vmul.f32 %v547_v4, %v1074_v3  ;;  %v704_v4 = vld [vmem:[%s1240_s8 + $0x80] sm:$0xff] }
 0x2b2   : > { %v1081_v7 = vsub.f32 %v1025_v42, %v548_v5  ;;  %v715_v42 = vld [vmem:[%s1240_s8 + $0xd8] sm:$0xff] }
 0x2b3   : > { %745 = vmatpush.msrb.mxu2 %v715_v42  ;;  %v691_v5 = vld [vmem:[%s1240_s8 + $0x18] sm:$0xff] }
 0x2b4   : > { %v550_v9 = vmul.f32 %v1081_v7, %v1081_v7 }
 0x2b5   : > { %746 = vmatpush.msrb.mxu2 %v714_v44 }
 0x2b6   : > { %v618_v10 = vpop.f32.mrf.mxu3  ;;  %552 = vrot.lane.b32.xlu2 %v550_v9, %s890_s20  ;;  %v502_v9 = vadd.f32 %v501_v6, %v1020_v38 }
 0x2b7   : > { %v619_v11 = vadd.f32 %v618_v10, %v592_v8  ;;  %v510_v16 = vpop.xlane.xlu1 %509  ;;  %747 = vmatpush.msrb.mxu2 %v713_v46  ;;  %v690_v8 = vld [vmem:[%s1240_s8 + $0x10] sm:$0xff]  ;;  %v761_v46 = vlaneseq }
 0x2b8   : > { %v518_v17 = vmul.f32 %v1074_v3, %v510_v16 }
 0x2b9   : > { %v641_v30 = vmax.f32 %v619_v11, 0.0  ;;  %748 = vmatpush.msrb.mxu2 %v712_v48  ;;  %v762_v48 = vand.u32 127, %v761_v46 }
 0x2ba   : > { %v1088_v18 = vsub.f32 %v504_v52, %v518_v17  ;;  %v710_v52 = vld [vmem:[%s1240_s8 + $0xb0] sm:$0xff] }
 0x2bb   : > { %749 = vmatpush.msrb.mxu2 %v711_v50  ;;  %vm763_vm11 = vcmp.ge.s32.totalorder %v762_v48, 48  ;;  %vm764_vm12 = vcmp.lt.s32.totalorder %v762_v48, 52 }
 0x2bc   : > { %v520_v19 = vmul.f32 %v1088_v18, %v1088_v18  ;;  %vm765_vm13 = vmand %vm763_vm11, %vm764_vm12 }
 0x2bd   : > { %750 = vmatpush.msrb.mxu2 %v710_v52 }
 0x2be   : > { %v638_v13 = vpop.f32.mrf.mxu3  ;;  %v521_v20 = vsel %vm425_vm2, %v520_v19, 0.0 }
 0x2bf   : > { %v639_v14 = vadd.f32 %v638_v13, %v593_v12  ;;  %751 = vmatpush.msrb.mxu2 %v709_v55  ;;  %v689_v12 = vld [vmem:[%s1240_s8 + $0x8] sm:$0xff]  ;;  %v688_v13 = vld [vmem:[%s1240_s8] sm:$0xff] }
 0x2c1   : > { %v642_v15 = vmax.f32 %v639_v14, 0.0  ;;  %752 = vmatpush.msrb.mxu2 %v708_v58 }
 0x2c3   : > { %851 = vmatmul.msk.f32.vlgmr.msrb.gmra.mxu1 %vm652_vm4, %v642_v15  ;;  %753 = vmatpush.msrb.mxu2 %v707_v60 }
 0x2c5   : > { %754 = vmatpush.msrb.mxu2 %v706_v62 }
 0x2c7   : > { %755 = vmatpush.msrb.mxu2 %v705_v1 }
 0x2c9   : > { %756 = vmatpush.msrb.mxu2 %v704_v4 }
 0x2df   : > { %522 = vadd.xlane.f32.xlu2 %v521_v20 }
 0x310   : > { %v553_v22 = vpop.permute.xlu2 %552 }
 0x311   : > { %v555_v23 = vsel %vm425_vm2, %v553_v22, 0.0  ;;  %v573_v22 = vpop.permute.xlu1 %572 }
 0x312   : > { %556 = vadd.xlane.f32.xlu0 %v555_v23 }
 0x340   : > { %v673_v28 = vpop.f32.mrf.mxu1 }
 0x341   : > { %v674_v29 = vadd.f32 %v673_v28, %v651_v27 }
 0x343   : > { %v676_v31 = vmax.f32 %v674_v29, 0.0 }
 0x345   : > { %v868_v32 = vpack.i.bf16 %v676_v31, %v641_v30  ;;  %v506_v31 = vld [vmem:[%s1241_s9 + $0x4] ss:$0 sm:$0xff] }
 0x347   : > { %869 = vrot.lane.b32.xlu1 %v868_v32, %s889_s19  ;;  %s1201_s19 = scalar_lea.vmem %s1242_s10, %s855_s27 }
 0x348   : > { %772 = vst [vmem:[%s1201_s19 + $0x8] sm:$0xff] %v502_v9 }
 0x34f   : > { %577 = vrot.lane.b32.xlu1 %v540_v33, %s892_s16 }
 0x352   : > { %v523_v54 = vpop.xlane.xlu2 %522 }
 0x353   : > { %v524_v59 = vmul.f32 %v523_v54, %v1074_v3 }
 0x355   : > { %v525_v63 = vadd.f32 1e-05, %v524_v59 }
 0x357   : > { %875 = vrsqrt.f32 %v525_v63  ;;  %vm532_vm6 = vweird.f32 %v525_v63 }
 0x35d   : > { %v876_v10 = vpop.eup %875 }
 0x35e   : > { %v527_v14 = vmul.f32 %v876_v10, %v525_v63  ;;  %vm533_vm5 = vweird.f32 %v876_v10 }
 0x35f   : > { %vm534_vm8 = vmor %vm532_vm6, %vm533_vm5 }
 0x360   : > { %v528_v16 = vmul.f32 %v876_v10, %v527_v14 }
 0x362   : > { %v529_v38 = vmul.f32 0.5, %v528_v16 }
 0x364   : > { %v530_v20 = vsub.f32 1.5, %v529_v38 }
 0x366   : > { %v531_v23 = vmul.f32 %v876_v10, %v530_v20 }
 0x368   : > { %v535_v25 = vsel %vm534_vm8, %v876_v10, %v531_v23 }
 0x369   : > { %v536_v28 = vmul.f32 %v535_v25, %v1088_v18 }
 0x36b   : > { %v537_v34 = vmul.f32 %v536_v28, %v506_v31 }
 0x36d   : > { %v538_v18 = vadd.f32 %v537_v34, %v507_v35 }
 0x385   : > { %v557_v57 = vpop.xlane.xlu0 %556 }
 0x386   : > { %v558_v61 = vmul.f32 %v557_v57, %v1074_v3  ;;  %v692_v3 = vld [vmem:[%s1240_s8 + $0x20] sm:$0xff] }
 0x387   : > { %732 = vmatpush.msrb.mxu0 %v692_v3 }
 0x388   : > { %v559_v0 = vadd.f32 1e-05, %v558_v61 }
 0x389   : > { %733 = vmatpush.msrb.mxu0 %v691_v5 }
 0x38a   : > { %877 = vrsqrt.f32 %v559_v0  ;;  %vm566_vm9 = vweird.f32 %v559_v0 }
 0x38b   : > { %734 = vmatpush.msrb.mxu0 %v690_v8 }
 0x38d   : > { %735 = vmatpush.msrb.mxu0 %v689_v12 }
 0x38f   : > { %736 = vmatpush.msrb.mxu0 %v688_v13 }
 0x390   : > { %v878_v11 = vpop.eup %877 }
 0x391   : > { %v561_v15 = vmul.f32 %v878_v11, %v559_v0  ;;  %vm567_vm7 = vweird.f32 %v878_v11 }
 0x392   : > { %vm568_vm10 = vmor %vm566_vm9, %vm567_vm7 }
 0x393   : > { %v562_v17 = vmul.f32 %v878_v11, %v561_v15 }
 0x395   : > { %v563_v19 = vmul.f32 0.5, %v562_v17 }
 0x397   : > { %v564_v21 = vsub.f32 1.5, %v563_v19 }
 0x399   : > { %v565_v24 = vmul.f32 %v878_v11, %v564_v21 }
 0x39b   : > { %v569_v26 = vsel %vm568_vm10, %v878_v11, %v565_v24 }
 0x39c   : > { %v570_v32 = vmul.f32 %v569_v26, %v1081_v7  ;;  %v720_v7 = vld [vmem:[%s1241_s9 + $0x3] ss:$0 sm:$0xff] }
 0x39e   : > { %v575_v36 = vmul.f32 %v573_v22, %v570_v32 }
 0x3b9   : > { %v870_v27 = vpop.permute.xlu1 %869 }
 0x3ba   : > { %v872_v29 = vunpack.i.h.bf16 %v870_v27  ;;  %v871_v30 = vunpack.i.l.bf16 %v870_v27 }
 0x3bc   : > { %v687_v33 = vsel %vm652_vm4, %v871_v30, %v872_v29 }
 0x3bd   : > { %757 = vmatmul.f32.vlgmr.msrb.gmra.mxu2 %v687_v33 }
 0x3c1   : > { %v578_v37 = vpop.permute.xlu1 %577 }
 0x3c2   : > { %v580_v39 = vadd.f32 %v578_v37, %v575_v36 }
 0x3c4   : > { %v685_v40 = vsel %vm425_vm2, %v538_v18, %v580_v39 }
 0x3c5   : > { %v686_v41 = vsel %vm652_vm4, %v685_v40, %v871_v30 }
 0x3c6   : > { %737 = vmatmul.f32.vlgmr.msrb.gmra.mxu0 %v686_v41 }
 0x440   : > { %v758_v44 = vpop.f32.mrf.mxu2 }
 0x443   : > { %v738_v42 = vpop.f32.mrf.mxu0 }
 0x444   : > { %v739_v43 = vadd.f32 %v738_v42, %v720_v7 }
 0x446   : > { %v759_v45 = vadd.f32 %v758_v44, %v739_v43 }
 0x448   : > { %v766_v47 = vmul.f32 0.5, %v759_v45 }
 0x44a   : > { %879 = vtanh.f32 %v766_v47 }
 0x450   : > { %v880_v49 = vpop.eup %879 }
 0x451   : > { %v768_v50 = vadd.f32 1.0, %v880_v49 }
 0x453   : > { %v769_v51 = vmul.f32 0.5, %v768_v50 }
 0x455   : > { %v770_v52 = vsel %vm765_vm13, %v769_v51, %v759_v45 }
 0x456   : > { %771 = vst [vmem:[%s1201_s19] sm:$0xff] %v770_v52 }
 0x457 PF: > { %s20_s13 = sadd.s32 1, %s887_s13  }
 0x458   : > { %p17_p4 = scmp.ge.s32.totalorder %s20_s13, 4  }
 0x45a   :  { %19 = sbr.rel (!%p17_p4) target bundleno = 1 (0x1), region = 91 }

</bundles_post_ra>
